<compile_context>
chip_gen: v5e
topology: v5e:2x2
jax: 0.10.0
libtpu: 0.0.40
codegen_flags: <defaults>
</compile_context>

<pallas_src>
import functools

import jax
import jax.numpy as jnp
from jax import lax
from jax.experimental import pallas as pl
from jax.experimental.pallas import tpu as pltpu

BN_EPS = 1e-5
LANE = 128
VMEM_LIMIT = 32 << 20  # safe on v5e/v6e (128 MiB) and v7x (64 MiB physical)


def _round_up(x, m):
    return (x + m - 1) // m * m


# ----------------------------------------------------------------------------
# Phase 1: tiled conv-as-matmul + per-channel sum / sum-of-squares accumulation
# ----------------------------------------------------------------------------
def _matmul_stats_kernel(a_ref, w_ref, y_ref, sum_ref, sq_ref):
    # a_ref:   (TM, K_pad)   bf16 im2col tile
    # w_ref:   (K_pad, C_pad) bf16 weights (resident across the grid)
    # y_ref:   (TM, C_pad)   f32 conv output tile
    # sum_ref: (1, C_pad)    f32 running per-channel sum   (resident accumulator)
    # sq_ref:  (1, C_pad)    f32 running per-channel sumsq (resident accumulator)
    i = pl.program_id(0)

    @pl.when(i == 0)
    def _():
        sum_ref[...] = jnp.zeros_like(sum_ref)
        sq_ref[...] = jnp.zeros_like(sq_ref)

    y = jnp.dot(a_ref[...], w_ref[...], preferred_element_type=jnp.float32)
    y_ref[...] = y
    sum_ref[...] += jnp.sum(y, axis=0, keepdims=True)
    sq_ref[...] += jnp.sum(y * y, axis=0, keepdims=True)


# ----------------------------------------------------------------------------
# Phase 2: BatchNorm (training-mode batch stats, biased var) + ReLU, tiled over M
# ----------------------------------------------------------------------------
def _bn_relu_kernel(y_ref, sum_ref, sq_ref, g_ref, b_ref, o_ref, *, inv_m):
    mean = sum_ref[...] * inv_m
    var = sq_ref[...] * inv_m - mean * mean          # biased variance (PyTorch BN norm)
    inv_std = lax.rsqrt(var + BN_EPS)                # EUP slot
    scale = inv_std * g_ref[...]
    shift = b_ref[...] - mean * scale
    o_ref[...] = jnp.maximum(y_ref[...] * scale + shift, 0.0)


# ----------------------------------------------------------------------------
# Wrapper glue
# ----------------------------------------------------------------------------
def _im2col_nchw(x, kh, kw, stride, padding):
    # x: (N, C, H, W) -> (N*OH*OW, C*kh*kw) with (C, kh, kw) feature ordering,
    # matching torch weight.reshape(C_out, -1).
    n, c, h, w = x.shape
    xp = jnp.pad(x, ((0, 0), (0, 0), (padding, padding), (padding, padding)))
    oh = (h + 2 * padding - kh) // stride + 1
    ow = (w + 2 * padding - kw) // stride + 1
    cols = []
    for di in range(kh):
        for dj in range(kw):
            sl = xp[:, :, di:di + (oh - 1) * stride + 1:stride,
                          dj:dj + (ow - 1) * stride + 1:stride]
            cols.append(sl)  # (N, C, OH, OW)
    patches = jnp.stack(cols, axis=0)                       # (kh*kw, N, C, OH, OW)
    patches = jnp.transpose(patches, (1, 3, 4, 2, 0))       # (N, OH, OW, C, kh*kw)
    return patches.reshape(n * oh * ow, c * kh * kw), oh, ow


def bn_conv2d_forward(x, weight, gamma, beta, *, stride, padding, tm=256):
    """x: (N, C_in, H, W) NCHW (f32).  weight: (C_out, C_in, kh, kw) (PyTorch layout)."""
    n, c_in, h, w = x.shape
    c_out, _, kh, kw = weight.shape

    a, oh, ow = _im2col_nchw(x.astype(jnp.float32), kh, kw, stride, padding)
    m, k = a.shape

    m_pad = _round_up(m, tm)
    k_pad = _round_up(k, LANE)
    c_pad = _round_up(c_out, LANE)
    n_tiles = m_pad // tm

    # Zero padding: pad rows of A give y == 0 and contribute nothing to the
    # sum / sumsq accumulators (we divide by the true M); pad channels get
    # gamma = beta = 0 and are sliced off below.
    a_p = jnp.pad(a, ((0, m_pad - m), (0, k_pad - k))).astype(jnp.bfloat16)
    wmat = weight.reshape(c_out, c_in * kh * kw).T.astype(jnp.float32)   # (K, C_out)
    w_p = jnp.pad(wmat, ((0, k_pad - k), (0, c_pad - c_out))).astype(jnp.bfloat16)
    g_p = jnp.pad(gamma.reshape(1, c_out).astype(jnp.float32),
                  ((0, 0), (0, c_pad - c_out)))
    b_p = jnp.pad(beta.reshape(1, c_out).astype(jnp.float32),
                  ((0, 0), (0, c_pad - c_out)))

    # -------- Phase 1: matmul + batch-stat accumulation --------
    y, ch_sum, ch_sq = pl.pallas_call(
        _matmul_stats_kernel,
        out_shape=(
            jax.ShapeDtypeStruct((m_pad, c_pad), jnp.float32),
            jax.ShapeDtypeStruct((1, c_pad), jnp.float32),
            jax.ShapeDtypeStruct((1, c_pad), jnp.float32),
        ),
        grid=(n_tiles,),
        in_specs=[
            pl.BlockSpec((tm, k_pad), lambda i: (i, 0)),
            pl.BlockSpec((k_pad, c_pad), lambda i: (0, 0)),
        ],
        out_specs=(
            pl.BlockSpec((tm, c_pad), lambda i: (i, 0)),
            pl.BlockSpec((1, c_pad), lambda i: (0, 0)),   # resident accumulator
            pl.BlockSpec((1, c_pad), lambda i: (0, 0)),   # resident accumulator
        ),
        compiler_params=pltpu.CompilerParams(
            dimension_semantics=("arbitrary",),
            vmem_limit_bytes=VMEM_LIMIT,
        ),
    )(a_p, w_p)

    # -------- Phase 2: BN apply + ReLU --------
    out_flat = pl.pallas_call(
        functools.partial(_bn_relu_kernel, inv_m=1.0 / float(m)),
        out_shape=jax.ShapeDtypeStruct((m_pad, c_pad), jnp.float32),
        grid=(n_tiles,),
        in_specs=[
            pl.BlockSpec((tm, c_pad), lambda i: (i, 0)),
            pl.BlockSpec((1, c_pad), lambda i: (0, 0)),
            pl.BlockSpec((1, c_pad), lambda i: (0, 0)),
            pl.BlockSpec((1, c_pad), lambda i: (0, 0)),
            pl.BlockSpec((1, c_pad), lambda i: (0, 0)),
        ],
        out_specs=pl.BlockSpec((tm, c_pad), lambda i: (i, 0)),
        compiler_params=pltpu.CompilerParams(
            dimension_semantics=("parallel",),      # shards across v7x's 2 TCs
            vmem_limit_bytes=VMEM_LIMIT,
        ),
    )(y, ch_sum, ch_sq, g_p, b_p)

    # Explicitly slice off padded rows/channels, then restore NCHW interface.
    out = out_flat[:m, :c_out].reshape(n, oh, ow, c_out).transpose(0, 3, 1, 2)
    return out


# ----------------------------------------------------------------------------
# Pure-JAX reference (f32) for validation
# ----------------------------------------------------------------------------
def _reference(x, weight, gamma, beta, *, stride, padding):
    y = lax.conv_general_dilated(
        x, weight, window_strides=(stride, stride),
        padding=((padding, padding), (padding, padding)),
        dimension_numbers=("NCHW", "OIHW", "NCHW"))
    mean = jnp.mean(y, axis=(0, 2, 3), keepdims=True)
    var = jnp.mean(jnp.square(y - mean), axis=(0, 2, 3), keepdims=True)  # biased
    normed = (y - mean) * lax.rsqrt(var + BN_EPS)
    normed = normed * gamma.reshape(1, -1, 1, 1) + beta.reshape(1, -1, 1, 1)
    return jnp.maximum(normed, 0.0)


if __name__ == "__main__":
    # Module config: BN_Conv2d(in_channels=4, out_channels=8, kernel_size=3,
    #                          stride=1, padding=1)
    N, C_IN, H, W = 2, 4, 16, 16
    C_OUT, KH, KW = 8, 3, 3
    STRIDE, PAD = 1, 1

    key = jax.random.PRNGKey(0)
    kx, kw_, kg, kb = jax.random.split(key, 4)

    x = jax.random.normal(kx, (N, C_IN, H, W), dtype=jnp.float32)
    weight = jax.random.normal(kw_, (C_OUT, C_IN, KH, KW), dtype=jnp.float32) * 0.1
    gamma = 1.0 + 0.1 * jax.random.normal(kg, (C_OUT,), dtype=jnp.float32)
    beta = 0.1 * jax.random.normal(kb, (C_OUT,), dtype=jnp.float32)

    out = bn_conv2d_forward(x, weight, gamma, beta, stride=STRIDE, padding=PAD)
    jax.block_until_ready(out)

    assert out.shape == (N, C_OUT, H, W), out.shape
    assert bool(jnp.all(out >= 0.0))  # ReLU post-condition

    ref = _reference(x, weight, gamma, beta, stride=STRIDE, padding=PAD)
    max_err = float(jnp.max(jnp.abs(out - ref)))
    assert max_err < 0.15, f"max abs error vs f32 reference too large: {max_err}"

    print("KERNEL_OK")
</pallas_src>

<mosaic_0001>
module attributes {stable_mosaic.version = 11 : i64} {
  func.func @_matmul_stats_kernel(%arg0: i32, %arg1: memref<256x128xbf16, #tpu.memory_space<vmem>>, %arg2: memref<128x128xbf16, #tpu.memory_space<vmem>>, %arg3: memref<256x128xf32, #tpu.memory_space<vmem>>, %arg4: memref<1x128xf32, #tpu.memory_space<vmem>>, %arg5: memref<1x128xf32, #tpu.memory_space<vmem>>) attributes {dimension_semantics = [#tpu.dimension_semantics<arbitrary>], iteration_bounds = array<i64: 2>, scalar_prefetch = 0 : i64, scratch_operands = 0 : i64, tpu.core_type = #tpu.core_type<tc>, window_params = [{transform_indices = @transform_0, window_bounds = array<i64: 256, 128>}, {pipeline_mode = #tpu.pipeline_mode<synchronous>, transform_indices = @transform_1, window_bounds = array<i64: 128, 128>}, {transform_indices = @transform_2, window_bounds = array<i64: 256, 128>}, {pipeline_mode = #tpu.pipeline_mode<synchronous>, transform_indices = @transform_3, window_bounds = array<i64: 1, 128>}, {pipeline_mode = #tpu.pipeline_mode<synchronous>, transform_indices = @transform_4, window_bounds = array<i64: 1, 128>}]} {
    %c0_i32 = arith.constant 0 : i32
    %0 = arith.cmpi eq, %arg0, %c0_i32 : i32
    %1 = arith.extui %0 : i1 to i32
    %c0_i32_0 = arith.constant 0 : i32
    %2 = arith.cmpi ne, %1, %c0_i32_0 : i32
    scf.if %2 {
      %cst_16 = arith.constant 0.000000e+00 : f32
      %18 = vector.broadcast %cst_16 : f32 to vector<1x128xf32>
      %c0_17 = arith.constant 0 : index
      %c0_18 = arith.constant 0 : index
      %19 = vector.load %arg4[%c0_17, %c0_18] : memref<1x128xf32, #tpu.memory_space<vmem>>, vector<1x128xf32>
      tpu.vector_store %arg4[%c0_17, %c0_18], %18 {strides = array<i32>} : memref<1x128xf32, #tpu.memory_space<vmem>>, vector<1x128xf32>,
      %cst_19 = arith.constant 0.000000e+00 : f32
      %20 = vector.broadcast %cst_19 : f32 to vector<1x128xf32>
      %c0_20 = arith.constant 0 : index
      %c0_21 = arith.constant 0 : index
      %21 = vector.load %arg5[%c0_20, %c0_21] : memref<1x128xf32, #tpu.memory_space<vmem>>, vector<1x128xf32>
      tpu.vector_store %arg5[%c0_20, %c0_21], %20 {strides = array<i32>} : memref<1x128xf32, #tpu.memory_space<vmem>>, vector<1x128xf32>,
    } else {
    }
    %c0 = arith.constant 0 : index
    %c0_1 = arith.constant 0 : index
    %3 = vector.load %arg1[%c0, %c0_1] : memref<256x128xbf16, #tpu.memory_space<vmem>>, vector<256x128xbf16>
    %c0_2 = arith.constant 0 : index
    %c0_3 = arith.constant 0 : index
    %4 = vector.load %arg2[%c0_2, %c0_3] : memref<128x128xbf16, #tpu.memory_space<vmem>>, vector<128x128xbf16>
    %cst = arith.constant dense<0.000000e+00> : vector<256x128xf32>
    %5 = tpu.matmul %3, %4, %cst {dimension_numbers = #tpu.dot_dimension_numbers<[1], [0], [0], [1], [0, 0, 1, 1], [], []>} : vector<256x128xbf16>, vector<128x128xbf16>, vector<256x128xf32> -> vector<256x128xf32>
    %c0_4 = arith.constant 0 : index
    %c0_5 = arith.constant 0 : index
    %6 = vector.load %arg3[%c0_4, %c0_5] : memref<256x128xf32, #tpu.memory_space<vmem>>, vector<256x128xf32>
    tpu.vector_store %arg3[%c0_4, %c0_5], %5 {strides = array<i32>} : memref<256x128xf32, #tpu.memory_space<vmem>>, vector<256x128xf32>,
    %c0_6 = arith.constant 0 : index
    %c0_7 = arith.constant 0 : index
    %7 = vector.load %arg4[%c0_6, %c0_7] : memref<1x128xf32, #tpu.memory_space<vmem>>, vector<1x128xf32>
    %cst_8 = arith.constant dense<0.000000e+00> : vector<128xf32>
    %8 = vector.multi_reduction <add>, %5, %cst_8 [0] : vector<256x128xf32> to vector<128xf32>
    %9 = vector.shape_cast %8 : vector<128xf32> to vector<1x128xf32>
    %10 = arith.addf %7, %9 : vector<1x128xf32>
    %c0_9 = arith.constant 0 : index
    %c0_10 = arith.constant 0 : index
    %11 = vector.load %arg4[%c0_9, %c0_10] : memref<1x128xf32, #tpu.memory_space<vmem>>, vector<1x128xf32>
    tpu.vector_store %arg4[%c0_9, %c0_10], %10 {strides = array<i32>} : memref<1x128xf32, #tpu.memory_space<vmem>>, vector<1x128xf32>,
    %c0_11 = arith.constant 0 : index
    %c0_12 = arith.constant 0 : index
    %12 = vector.load %arg5[%c0_11, %c0_12] : memref<1x128xf32, #tpu.memory_space<vmem>>, vector<1x128xf32>
    %13 = arith.mulf %5, %5 : vector<256x128xf32>
    %cst_13 = arith.constant dense<0.000000e+00> : vector<128xf32>
    %14 = vector.multi_reduction <add>, %13, %cst_13 [0] : vector<256x128xf32> to vector<128xf32>
    %15 = vector.shape_cast %14 : vector<128xf32> to vector<1x128xf32>
    %16 = arith.addf %12, %15 : vector<1x128xf32>
    %c0_14 = arith.constant 0 : index
    %c0_15 = arith.constant 0 : index
    %17 = vector.load %arg5[%c0_14, %c0_15] : memref<1x128xf32, #tpu.memory_space<vmem>>, vector<1x128xf32>
    tpu.vector_store %arg5[%c0_14, %c0_15], %16 {strides = array<i32>} : memref<1x128xf32, #tpu.memory_space<vmem>>, vector<1x128xf32>,
    return
  }
  func.func @transform_0(%arg0: i32) -> (i32, i32) {
    %c0_i32 = arith.constant 0 : i32
    %c0_i32_0 = arith.constant 0 : i32
    return %arg0, %c0_i32 : i32, i32
  }
  func.func @transform_1(%arg0: i32) -> (i32, i32) {
    %c0_i32 = arith.constant 0 : i32
    %c0_i32_0 = arith.constant 0 : i32
    %c0_i32_1 = arith.constant 0 : i32
    return %c0_i32, %c0_i32_0 : i32, i32
  }
  func.func @transform_2(%arg0: i32) -> (i32, i32) {
    %c0_i32 = arith.constant 0 : i32
    %c0_i32_0 = arith.constant 0 : i32
    return %arg0, %c0_i32 : i32, i32
  }
  func.func @transform_3(%arg0: i32) -> (i32, i32) {
    %c0_i32 = arith.constant 0 : i32
    %c0_i32_0 = arith.constant 0 : i32
    %c0_i32_1 = arith.constant 0 : i32
    return %c0_i32, %c0_i32_0 : i32, i32
  }
  func.func @transform_4(%arg0: i32) -> (i32, i32) {
    %c0_i32 = arith.constant 0 : i32
    %c0_i32_0 = arith.constant 0 : i32
    %c0_i32_1 = arith.constant 0 : i32
    return %c0_i32, %c0_i32_0 : i32, i32
  }
}

</mosaic_0001>

<bundles_post_ra>
// kernel: tpu_custom_call.1
= control target key start
LH: loop header
LB: loop body
LE: loop exit
PB: predicated region body
PF: predicated region fallthrough
CT: control target
= control target key end

     0   :  { %10 = vsyncpa [#allocation3], 0  ;;  %s1632_s0 = inlined_call_operand.hbm [shape: bf16[512,128], index: 0, kind: input, shape index: {}]   ;;  %s1633_s1 = inlined_call_operand.hbm [shape: bf16[128,128], index: 1, kind: input, shape index: {}]   ;;  %s1634_s2 = inlined_call_operand.hbm [shape: f32[512,128], index: 2, kind: output, shape index: {0}]   ;;  %s1635_s3 = inlined_call_operand.hbm [shape: f32[1,128], index: 3, kind: output, shape index: {1}]   ;;  %s1636_s4 = inlined_call_operand.hbm [shape: f32[1,128], index: 4, kind: output, shape index: {2}]  }
   0x1   :  { %12 = vsyncpa [#allocation3 + $0x1], 0 }
   0x2   :  { %13 = vsyncpa [#allocation6], 0 }
   0x3   :  { %14 = vsyncpa [#allocation4], 0 }
   0x4   :  { %16 = vsyncpa [#allocation4 + $0x1], 0 }
   0x5   :  { %17 = vsyncpa [#allocation9], 0  ;;  %s1278_s15 = smov 0   ;;  %s1280_s16 = smov 0  }
   0x6   :  { %s1282_s17 = smov 0   ;;  %s1284_s18 = smov 0  }
   0x7 LB: > { %s1299_s19 = sadd.s32 4294967295, %s1243_s18   ;;  %s810_s20 = sadd.s32 4294967294, %s1243_s18   ;;  %s1243_s18 = sphi %s1284_s18, %s1652_s18   ;;  %s1239_s17 = sphi %s1282_s17, %s1651_s17   ;;  %s1235_s16 = sphi %s1280_s16, %s1650_s16   ;;  %s1231_s15 = sphi %s1278_s15, %s1649_s15  }
   0x8   : > { %p43_p0 = scmp.ne.s32.totalorder %s1235_s16, %s1231_s15  ;;  %p44_p1 = scmp.eq.s32.totalorder %s1299_s19, 0 }
   0x9   : > { %p1637_p2 = scmp.eq.s32.totalorder %s1299_s19, 1  ;;  %p94_p3 = scmp.eq.s32.totalorder %s810_s20, 1 }
   0xa   : > { %p1308_p4 = por %p44_p1, %p43_p0  ;;  %p811_p5 = scmp.ge.s32.totalorder %s1243_s18, 1 }
   0xb   : > { %p1313_p6 = por %p94_p3, %p43_p0  ;;  %p143_p7 = scmp.lt.s32.totalorder %s1243_s18, 3 }
   0xc   : > { %s154_s25 = sshll.u32 %s1633_s1, 4  ;;  %s1245_s27 = smov [#allocation5]   ;;  %s155_s25 = int_to_ptr.hbm [resolvable:$true] %s154_s25 }
   0xd   : > { %p1322_p9 = pnand %p811_p5, %p143_p7  ;;  %s156_s28 = sshll.u32 %s1245_s27, 4  ;;  %s157_s28 = int_to_ptr.vmem [resolvable:$true] %s156_s28 }
   0xe   : > { %s1332_s29 = sadd.s32 1, %s1243_s18   ;;  %s1246_s30 = smov 64  }
   0xf   : > { %p993_p10 = pneg %p1322_p9  ;;  %s1247_s5 = smov 4  }
  0x10   : > { %s27_s6 = ssub.s32 %s1243_s18, %s1332_s29  ;;  %s30_s7 = sadd.s32 1, %s1239_s17 }
  0x11   : > { %p994_p11 = pnand %p993_p10, %p44_p1  ;;  %p28_p13 = scmp.eq.s32.totalorder %s27_s6, 0 }
  0x12   : > { %p37_p0 = scmp.ne.s32.totalorder %s1239_s17, %s1235_s16  ;;  %p38_p3 = scmp.eq.s32.totalorder %s1243_s18, 0 }
  0x13   : > { %996 = dma.hbm_to_vmem [thread:$0]  (!%p994_p11), %s155_s25, 1024, %s157_s28, [#allocation6], %s1246_s30, %s1246_s30, %s1247_s5  }
  0x14   : > { %s1344_s8 = scalar_select %p28_p13, %s1239_s17, %s30_s7  }
  0x15   : > { %p1348_p5 = por %p1637_p2, %p37_p0  ;;  %p1006_p7 = scmp.lt.s32.totalorder %s1243_s18, 2 }
  0x16   : > { %s170_s10 = sand.u32 1, %s1239_s17   ;;  %s927_s11 = sshll.u32 %s1243_s18, 7 }
  0x17   : > { %p39_p10 = por %p38_p3, %p37_p0  ;;  %s814_s12 = sshll.u32 %s170_s10, 7 }
  0x18   : > { %s179_s20 = scalar_lea.hbm %s1632_s0, %s927_s11  ;;  %s174_s24 = scalar_lea.vmem [#allocation2], %s814_s12 }
  0x19   : > { %s180_s23 = sshll.u32 %s179_s20, 4  ;;  %s182_s25 = sshll.u32 %s174_s24, 4  ;;  %s181_s23 = int_to_ptr.hbm [resolvable:$true] %s180_s23  ;;  %s183_s25 = int_to_ptr.vmem [resolvable:$true] %s182_s25 }
  0x1a   : > { %p1358_p11 = pnand %p1006_p7, %p39_p10  ;;  %s171_s28 = scalar_lea.sflag [#allocation3], %s170_s10 }
  0x1b   : > { %s1083_s6 = sshra.s32 %s181_s23, 4  ;;  %s1090_s12 = scalar_lea.hbm %s1632_s0, 256  ;;  %s1084_s6 = int_to_ptr.hbm [resolvable:$true] %s1083_s6 }
  0x1c   : > { %s1085_s7 = scalar_lea.hbm %s1084_s6, 128  ;;  %p1087_p0 = pneg %p1358_p11 }
  0x1d   : > { %p1086_p13 = scmp.ne.s32.totalorder %s1084_s6, %s1085_s7  ;;  %p1091_p7 = scmp.lt.s32.totalorder %s1084_s6, %s1632_s0 }
  0x1e   : > { %p1092_p10 = scmp.lt.s32.totalorder %s1090_s12, %s1085_s7 }
  0x1f   : > { %p1088_p3 = pnand %p1087_p0, %p1086_p13 }
  0x20   : > { %p1093_p2 = por %p1092_p10, %p1091_p7 }
  0x21   : > { %p1089_p12 = pneg %p1088_p3 }
  0x23   : > { %p1094_p8 = pnand %p1093_p2, %p1089_p12 }
  0x25   : > { %1097 = shalt.err (!%p1094_p8)
}
  0x26   : > { %1000 = dma.hbm_to_vmem [thread:$0]  (!%p1358_p11), %s181_s23, 2048, %s183_s25, %s171_s28, %s1246_s30, %s1246_s30, %s1247_s5  }
  0x27   : > { %194 = sbr.rel (%p1322_p9) target bundleno = 342 (0x156), region = 28  ;;  %s1378_s10 = sand.u32 (!%p1322_p9), 1, %s1235_s16  }
  0x28   : > { %s818_s24 = sshll.u32 (!%p1322_p9), %s1378_s10, 7  ;;  %s197_s6 = scalar_lea.sflag (!%p1322_p9), [#allocation3], %s1378_s10 }
  0x29   : > { %s1382_s7 = scalar_lea.vmem (!%p1322_p9), [#allocation2], %s818_s24 }
  0x2c   : > { %1214 = dma.done.wait (%p1308_p4), %s197_s6, 2048  }
  0x2d   : > { %1216 = vsyncadd (%p1308_p4), %s197_s6, 4294965248 }
  0x2e   : > { %1218 = dma.done.wait (%p44_p1), [#allocation6], 1024  }
  0x2f   : > { %1220 = vsyncadd (%p44_p1), [#allocation6], 4294966272  ;;  %s820_s26 = sshll.u32 %s1378_s10, 8  ;;  %p1643_p2 = scmp.ne.s32.totalorder %s1299_s19, 0 }
  0x30   : > { %s1393_s30 = scalar_lea.vmem [#allocation7], %s820_s26 }
  0x31   : > { %236 = sbr.rel (%p1643_p2) target bundleno = 57 (0x39), region = 40 }
  0x36   : > { %v1248_v0 = vmov 0.0  }
  0x37   : > { %237 = vst [vmem:[#allocation8] sm:$0x1] %v1248_v0 }
  0x38   : > { %238 = vst [vmem:[#allocation10] sm:$0x1] %v1248_v0 }
  0x39 PF: > { %v951_v1 = vld [vmem:[#allocation5 + $0x38] sm:$0xff]  ;;  %v950_v2 = vld [vmem:[#allocation5 + $0x30] sm:$0xff]  ;;  %v949_v3 = vld [vmem:[#allocation5 + $0x28] sm:$0xff]  ;;  %s952_s21 = sshll.u32 %s1299_s19, 8  ;;  %s677_s27 = sshll.u32 %s1393_s30, 4  ;;  %s1520_s27 = int_to_ptr.vmem [resolvable:$true] %s677_s27 }
  0x3a   : > { %431 = vmatpush.bf16.msra.mxu0 %v951_v1  ;;  %953 = vmatpush.bf16.msra.mxu1 %v951_v1  ;;  %v948_v4 = vld [vmem:[#allocation5 + $0x20] sm:$0xff]  ;;  %v947_v5 = vld [vmem:[#allocation5 + $0x18] sm:$0xff]  ;;  %v946_v6 = vld [vmem:[#allocation5 + $0x10] sm:$0xff]  ;;  %s676_s25 = scalar_lea.hbm %s1634_s2, %s952_s21  ;;  %s665_s11 = scalar_lea.sflag [#allocation4], %s1378_s10 }
  0x3b   : > { %954 = vmatpush.bf16.msra.mxu2 %v951_v1  ;;  %955 = vmatpush.bf16.msra.mxu3 %v951_v1  ;;  %v945_v7 = vld [vmem:[#allocation5 + $0x8] sm:$0xff]  ;;  %v944_v8 = vld [vmem:[#allocation5] sm:$0xff]  ;;  %v930_v17 = vld [vmem:[%s1382_s7 + $0x10] sm:$0xff]  ;;  %s679_s28 = sshll.u32 %s676_s25, 4  ;;  %s1133_s24 = scalar_lea.hbm %s1634_s2, 512  ;;  %s1522_s28 = int_to_ptr.hbm [resolvable:$true] %s679_s28 }
  0x3c   : > { %v928_v9 = vld [vmem:[%s1382_s7] sm:$0xff]  ;;  %v929_v13 = vld [vmem:[%s1382_s7 + $0x8] sm:$0xff]  ;;  %v934_v18 = vld [vmem:[%s1382_s7 + $0x30] sm:$0xff]  ;;  %s1127_s13 = sshra.s32 %s1522_s28, 4  ;;  %s1128_s13 = int_to_ptr.hbm [resolvable:$true] %s1127_s13 }
  0x3d   : > { %v932_v10 = vld [vmem:[%s1382_s7 + $0x20] sm:$0xff]  ;;  %v933_v14 = vld [vmem:[%s1382_s7 + $0x28] sm:$0xff]  ;;  %v938_v19 = vld [vmem:[%s1382_s7 + $0x50] sm:$0xff]  ;;  %s1129_s12 = scalar_lea.hbm %s1128_s13, 256  ;;  %p1134_p9 = scmp.lt.s32.totalorder %s1128_s13, %s1634_s2 }
  0x3e   : > { %432 = vmatpush.bf16.msra.mxu0 %v950_v2  ;;  %956 = vmatpush.bf16.msra.mxu1 %v950_v2  ;;  %v936_v11 = vld [vmem:[%s1382_s7 + $0x40] sm:$0xff]  ;;  %v937_v15 = vld [vmem:[%s1382_s7 + $0x48] sm:$0xff]  ;;  %v942_v20 = vld [vmem:[%s1382_s7 + $0x70] sm:$0xff]  ;;  %p1130_p1 = scmp.ne.s32.totalorder %s1128_s13, %s1129_s12  ;;  %p1135_p12 = scmp.lt.s32.totalorder %s1133_s24, %s1129_s12 }
  0x3f   : > { %957 = vmatpush.bf16.msra.mxu2 %v950_v2  ;;  %958 = vmatpush.bf16.msra.mxu3 %v950_v2  ;;  %v940_v12 = vld [vmem:[%s1382_s7 + $0x60] sm:$0xff]  ;;  %v941_v16 = vld [vmem:[%s1382_s7 + $0x68] sm:$0xff]  ;;  %v931_v21 = vld [vmem:[%s1382_s7 + $0x18] sm:$0xff] }
  0x40   : > { %v935_v22 = vld [vmem:[%s1382_s7 + $0x38] sm:$0xff]  ;;  %p1131_p4 = pnand %p1130_p1, %p1348_p5  ;;  %p1136_p11 = por %p1135_p12, %p1134_p9 }
  0x41   : > { %v939_v23 = vld [vmem:[%s1382_s7 + $0x58] sm:$0xff] }
  0x42   : > { %433 = vmatpush.bf16.msra.mxu0 %v949_v3  ;;  %959 = vmatpush.bf16.msra.mxu1 %v949_v3  ;;  %v943_v24 = vld [vmem:[%s1382_s7 + $0x78] sm:$0xff]  ;;  %p1132_p8 = pneg %p1131_p4 }
  0x43   : > { %960 = vmatpush.bf16.msra.mxu2 %v949_v3  ;;  %961 = vmatpush.bf16.msra.mxu3 %v949_v3 }
  0x44   : > { %p1137_p13 = pnand %p1136_p11, %p1132_p8 }
  0x46   : > { %434 = vmatpush.bf16.msra.mxu0 %v948_v4  ;;  %962 = vmatpush.bf16.msra.mxu1 %v948_v4 }
  0x47   : > { %963 = vmatpush.bf16.msra.mxu2 %v948_v4  ;;  %964 = vmatpush.bf16.msra.mxu3 %v948_v4 }
  0x4a   : > { %435 = vmatpush.bf16.msra.mxu0 %v947_v5  ;;  %965 = vmatpush.bf16.msra.mxu1 %v947_v5 }
  0x4b   : > { %966 = vmatpush.bf16.msra.mxu2 %v947_v5  ;;  %967 = vmatpush.bf16.msra.mxu3 %v947_v5 }
  0x4e   : > { %436 = vmatpush.bf16.msra.mxu0 %v946_v6  ;;  %968 = vmatpush.bf16.msra.mxu1 %v946_v6 }
  0x4f   : > { %969 = vmatpush.bf16.msra.mxu2 %v946_v6  ;;  %970 = vmatpush.bf16.msra.mxu3 %v946_v6 }
  0x52   : > { %437 = vmatpush.bf16.msra.mxu0 %v945_v7  ;;  %971 = vmatpush.bf16.msra.mxu1 %v945_v7 }
  0x53   : > { %972 = vmatpush.bf16.msra.mxu2 %v945_v7  ;;  %973 = vmatpush.bf16.msra.mxu3 %v945_v7 }
  0x56   : > { %438 = vmatpush.bf16.msra.mxu0 %v944_v8  ;;  %974 = vmatpush.bf16.msra.mxu1 %v944_v8 }
  0x57   : > { %975 = vmatpush.bf16.msra.mxu2 %v944_v8  ;;  %976 = vmatpush.bf16.msra.mxu3 %v944_v8 }
  0x59   : > { %439 = vmatmul.bf16.vlgmr.msra.gmra.mxu0 %v928_v9  ;;  %459 = vmatmul.bf16.vlgmr.msra.gmra.mxu1 %v932_v10 }
  0x5a   : > { %479 = vmatmul.bf16.vlgmr.msra.gmra.mxu2 %v936_v11  ;;  %499 = vmatmul.bf16.vlgmr.msra.gmra.mxu3 %v940_v12 }
  0x69   : > { %444 = vmatmul.bf16.gmra.mxu0 %v929_v13  ;;  %464 = vmatmul.bf16.gmra.mxu1 %v933_v14 }
  0x6a   : > { %484 = vmatmul.bf16.gmra.mxu2 %v937_v15  ;;  %504 = vmatmul.bf16.gmra.mxu3 %v941_v16 }
  0x79   : > { %449 = vmatmul.bf16.gmra.mxu0 %v930_v17  ;;  %469 = vmatmul.bf16.gmra.mxu1 %v934_v18 }
  0x7a   : > { %489 = vmatmul.bf16.gmra.mxu2 %v938_v19  ;;  %509 = vmatmul.bf16.gmra.mxu3 %v942_v20 }
  0x89   : > { %454 = vmatmul.bf16.gmra.mxu0 %v931_v21  ;;  %474 = vmatmul.bf16.gmra.mxu1 %v935_v22 }
  0x8a   : > { %494 = vmatmul.bf16.gmra.mxu2 %v939_v23  ;;  %514 = vmatmul.bf16.gmra.mxu3 %v943_v24 }
  0xd6   : > { %v440_v25 = vpop.f32.mrf.mxu0  ;;  %v1413_v26 = vpop.f32.mrf.mxu1 }
  0xd7   : > { %520 = vst [vmem:[%s1393_s30] sm:$0xff] %v440_v25  ;;  %v593_v48 = vmul.f32 %v440_v25, %v440_v25  ;;  %v601_v12 = vmul.f32 %v1413_v26, %v1413_v26 }
  0xd8   : > { %528 = vst [vmem:[%s1393_s30 + $0x40] sm:$0xff] %v1413_v26 }
  0xdd   : > { %v1418_v27 = vpop.f32.mrf.mxu2  ;;  %v1425_v30 = vpop.f32.mrf.mxu3 }
  0xde   : > { %v442_v28 = vpop.f32.mrf.mxu0  ;;  %v1420_v29 = vpop.f32.mrf.mxu1  ;;  %536 = vst [vmem:[%s1393_s30 + $0x80] sm:$0xff] %v1418_v27 }
  0xdf   : > { %521 = vst [vmem:[%s1393_s30 + $0x8] sm:$0xff] %v442_v28  ;;  %v594_v47 = vmul.f32 %v442_v28, %v442_v28  ;;  %v553_v49 = vadd.f32 %v442_v28, %v440_v25  ;;  %v602_v15 = vmul.f32 %v1420_v29, %v1420_v29 }
  0xe0   : > { %529 = vst [vmem:[%s1393_s30 + $0x48] sm:$0xff] %v1420_v29 }
  0xe1   : > { %544 = vst [vmem:[%s1393_s30 + $0xc0] sm:$0xff] %v1425_v30  ;;  %v625_v51 = vadd.f32 %v594_v47, %v593_v48 }
  0xe5   : > { %v1431_v31 = vpop.f32.mrf.mxu2  ;;  %v1438_v34 = vpop.f32.mrf.mxu3 }
  0xe6   : > { %v445_v32 = vpop.f32.mrf.mxu0  ;;  %v1433_v33 = vpop.f32.mrf.mxu1  ;;  %537 = vst [vmem:[%s1393_s30 + $0x88] sm:$0xff] %v1431_v31 }
  0xe7   : > { %522 = vst [vmem:[%s1393_s30 + $0x10] sm:$0xff] %v445_v32  ;;  %v595_v50 = vmul.f32 %v445_v32, %v445_v32  ;;  %v554_v52 = vadd.f32 %v553_v49, %v445_v32  ;;  %v603_v18 = vmul.f32 %v1433_v33, %v1433_v33 }
  0xe8   : > { %530 = vst [vmem:[%s1393_s30 + $0x50] sm:$0xff] %v1433_v33 }
  0xe9   : > { %545 = vst [vmem:[%s1393_s30 + $0xc8] sm:$0xff] %v1438_v34  ;;  %v626_v57 = vadd.f32 %v625_v51, %v595_v50 }
  0xed   : > { %v1444_v35 = vpop.f32.mrf.mxu2  ;;  %v1451_v38 = vpop.f32.mrf.mxu3 }
  0xee   : > { %v447_v36 = vpop.f32.mrf.mxu0  ;;  %v1446_v37 = vpop.f32.mrf.mxu1  ;;  %538 = vst [vmem:[%s1393_s30 + $0x90] sm:$0xff] %v1444_v35 }
  0xef   : > { %523 = vst [vmem:[%s1393_s30 + $0x18] sm:$0xff] %v447_v36  ;;  %v596_v53 = vmul.f32 %v447_v36, %v447_v36  ;;  %v555_v58 = vadd.f32 %v554_v52, %v447_v36  ;;  %v604_v22 = vmul.f32 %v1446_v37, %v1446_v37 }
  0xf0   : > { %531 = vst [vmem:[%s1393_s30 + $0x58] sm:$0xff] %v1446_v37 }
  0xf1   : > { %546 = vst [vmem:[%s1393_s30 + $0xd0] sm:$0xff] %v1451_v38  ;;  %v627_v61 = vadd.f32 %v626_v57, %v596_v53 }
  0xf5   : > { %v1457_v39 = vpop.f32.mrf.mxu2  ;;  %v1464_v42 = vpop.f32.mrf.mxu3 }
  0xf6   : > { %v450_v40 = vpop.f32.mrf.mxu0  ;;  %v1459_v41 = vpop.f32.mrf.mxu1  ;;  %539 = vst [vmem:[%s1393_s30 + $0x98] sm:$0xff] %v1457_v39 }
  0xf7   : > { %524 = vst [vmem:[%s1393_s30 + $0x20] sm:$0xff] %v450_v40  ;;  %v597_v59 = vmul.f32 %v450_v40, %v450_v40  ;;  %v556_v62 = vadd.f32 %v555_v58, %v450_v40 }
  0xf8   : > { %532 = vst [vmem:[%s1393_s30 + $0x60] sm:$0xff] %v1459_v41 }
  0xf9   : > { %547 = vst [vmem:[%s1393_s30 + $0xd8] sm:$0xff] %v1464_v42  ;;  %v628_v0 = vadd.f32 %v627_v61, %v597_v59 }
  0xfd   : > { %v1470_v43 = vpop.f32.mrf.mxu2  ;;  %v1477_v46 = vpop.f32.mrf.mxu3 }
  0xfe   : > { %v452_v44 = vpop.f32.mrf.mxu0  ;;  %v1472_v45 = vpop.f32.mrf.mxu1  ;;  %540 = vst [vmem:[%s1393_s30 + $0xa0] sm:$0xff] %v1470_v43 }
  0xff   : > { %525 = vst [vmem:[%s1393_s30 + $0x28] sm:$0xff] %v452_v44  ;;  %v598_v63 = vmul.f32 %v452_v44, %v452_v44  ;;  %v557_v1 = vadd.f32 %v556_v62, %v452_v44 }
 0x100   : > { %533 = vst [vmem:[%s1393_s30 + $0x68] sm:$0xff] %v1472_v45 }
 0x101   : > { %548 = vst [vmem:[%s1393_s30 + $0xe0] sm:$0xff] %v1477_v46  ;;  %v629_v3 = vadd.f32 %v628_v0, %v598_v63 }
 0x105   : > { %v1483_v54 = vpop.f32.mrf.mxu2  ;;  %v1490_v60 = vpop.f32.mrf.mxu3 }
 0x106   : > { %v455_v55 = vpop.f32.mrf.mxu0  ;;  %v1485_v56 = vpop.f32.mrf.mxu1  ;;  %541 = vst [vmem:[%s1393_s30 + $0xa8] sm:$0xff] %v1483_v54 }
 0x107   : > { %526 = vst [vmem:[%s1393_s30 + $0x30] sm:$0xff] %v455_v55  ;;  %v599_v2 = vmul.f32 %v455_v55, %v455_v55  ;;  %v558_v4 = vadd.f32 %v557_v1, %v455_v55 }
 0x108   : > { %534 = vst [vmem:[%s1393_s30 + $0x70] sm:$0xff] %v1485_v56 }
 0x109   : > { %549 = vst [vmem:[%s1393_s30 + $0xe8] sm:$0xff] %v1490_v60  ;;  %v630_v8 = vadd.f32 %v629_v3, %v599_v2 }
 0x10d   : > { %v1497_v5 = vpop.f32.mrf.mxu2  ;;  %v1502_v11 = vpop.f32.mrf.mxu3 }
 0x10e   : > { %v457_v6 = vpop.f32.mrf.mxu0  ;;  %v477_v7 = vpop.f32.mrf.mxu1  ;;  %542 = vst [vmem:[%s1393_s30 + $0xb0] sm:$0xff] %v1497_v5 }
 0x10f   : > { %527 = vst [vmem:[%s1393_s30 + $0x38] sm:$0xff] %v457_v6  ;;  %v559_v9 = vadd.f32 %v558_v4, %v457_v6  ;;  %v600_v10 = vmul.f32 %v457_v6, %v457_v6 }
 0x110   : > { %535 = vst [vmem:[%s1393_s30 + $0x78] sm:$0xff] %v477_v7 }
 0x111   : > { %v560_v13 = vadd.f32 %v559_v9, %v1413_v26  ;;  %v631_v14 = vadd.f32 %v630_v8, %v600_v10  ;;  %550 = vst [vmem:[%s1393_s30 + $0xf0] sm:$0xff] %v1502_v11  ;;  %v605_v26 = vmul.f32 %v1459_v41, %v1459_v41 }
 0x113   : > { %v561_v16 = vadd.f32 %v560_v13, %v1420_v29  ;;  %v632_v17 = vadd.f32 %v631_v14, %v601_v12 }
 0x115   : > { %v562_v19 = vadd.f32 %v561_v16, %v1433_v33  ;;  %v633_v20 = vadd.f32 %v632_v17, %v602_v15  ;;  %v497_v21 = vpop.f32.mrf.mxu2  ;;  %v1528_v25 = vpop.f32.mrf.mxu3 }
 0x116   : > { %543 = vst [vmem:[%s1393_s30 + $0xb8] sm:$0xff] %v497_v21 }
 0x117   : > { %v634_v23 = vadd.f32 %v633_v20, %v603_v18  ;;  %v563_v24 = vadd.f32 %v562_v19, %v1446_v37  ;;  %551 = vst [vmem:[%s1393_s30 + $0xf8] sm:$0xff] %v1528_v25 }
 0x119   : > { %v564_v28 = vadd.f32 %v563_v24, %v1459_v41  ;;  %v635_v29 = vadd.f32 %v634_v23, %v604_v22 }
 0x11a   : > { %1140 = shalt.err (!%p1137_p13)
}
 0x11b   : > { %s1249_s10 = smov 128   ;;  %s1250_s26 = smov 8   ;;  %v606_v32 = vmul.f32 %v1472_v45, %v1472_v45  ;;  %v565_v33 = vadd.f32 %v564_v28, %v1472_v45  ;;  %v636_v36 = vadd.f32 %v635_v29, %v605_v26  ;;  %v607_v40 = vmul.f32 %v1485_v56, %v1485_v56 }
 0x11c   : > { %983 = dma.vmem_to_hbm [thread:$0]  (%p1348_p5), %s1520_s27, 4096, %s1522_s28, %s665_s11, %s1249_s10, %s1249_s10, %s1250_s26   ;;  %v608_v48 = vmul.f32 %v477_v7, %v477_v7  ;;  %v609_v49 = vmul.f32 %v1418_v27, %v1418_v27  ;;  %v610_v52 = vmul.f32 %v1431_v31, %v1431_v31  ;;  %v611_v55 = vmul.f32 %v1444_v35, %v1444_v35 }
 0x11d   : > { %v566_v37 = vadd.f32 %v565_v33, %v1485_v56  ;;  %v637_v41 = vadd.f32 %v636_v36, %v606_v32  ;;  %v612_v58 = vmul.f32 %v1457_v39, %v1457_v39  ;;  %v614_v0 = vmul.f32 %v1483_v54, %v1483_v54  ;;  %s1251_s9 = smov [#allocation8]   ;;  %s694_s23 = sshll.u32 %s1635_s3, 4  ;;  %s695_s23 = int_to_ptr.hbm [resolvable:$true] %s694_s23 }
 0x11e   : > { %v615_v3 = vmul.f32 %v1497_v5, %v1497_v5  ;;  %v616_v6 = vmul.f32 %v497_v21, %v497_v21  ;;  %v618_v9 = vmul.f32 %v1438_v34, %v1438_v34  ;;  %v619_v12 = vmul.f32 %v1451_v38, %v1451_v38  ;;  %s692_s30 = sshll.u32 %s1251_s9, 4  ;;  %s1252_s25 = smov [#allocation10]   ;;  %s693_s30 = int_to_ptr.vmem [resolvable:$true] %s692_s30 }
 0x11f   : > { %v638_v44 = vadd.f32 %v637_v41, %v607_v40  ;;  %v567_v47 = vadd.f32 %v566_v37, %v477_v7  ;;  %v617_v7 = vmul.f32 %v1425_v30, %v1425_v30  ;;  %v620_v14 = vmul.f32 %v1464_v42, %v1464_v42  ;;  %v552_v41 = vld [vmem:[#allocation8] sm:$0x1]  ;;  %s704_s27 = sshll.u32 %s1252_s25, 4  ;;  %s706_s13 = sshll.u32 %s1636_s4, 4  ;;  %s705_s27 = int_to_ptr.vmem [resolvable:$true] %s704_s27  ;;  %s707_s13 = int_to_ptr.hbm [resolvable:$true] %s706_s13 }
 0x120   : > { %v622_v19 = vmul.f32 %v1490_v60, %v1490_v60  ;;  %v623_v22 = vmul.f32 %v1502_v11, %v1502_v11  ;;  %v624_v24 = vmul.f32 %v1528_v25, %v1528_v25  ;;  %p1644_p5 = scmp.eq.s32.totalorder %s1299_s19, 1 }
 0x121   : > { %v568_v50 = vadd.f32 %v567_v47, %v1418_v27  ;;  %v639_v51 = vadd.f32 %v638_v44, %v608_v48  ;;  %v613_v27 = vmul.f32 %v1470_v43, %v1470_v43  ;;  %v592_v44 = vld [vmem:[#allocation10] sm:$0x1] }
 0x122   : > { %p1645_p0 = pmov %p1644_p5 }
 0x123   : > { %v569_v45 = vadd.f32 %v568_v50, %v1431_v31  ;;  %v640_v53 = vadd.f32 %v639_v51, %v609_v49 }
 0x124   : > { %p1646_p3 = pmov %p1645_p0 }
 0x125   : > { %v570_v56 = vadd.f32 %v569_v45, %v1444_v35  ;;  %v641_v57 = vadd.f32 %v640_v53, %v610_v52 }
 0x127   : > { %v642_v59 = vadd.f32 %v641_v57, %v611_v55  ;;  %v571_v61 = vadd.f32 %v570_v56, %v1457_v39 }
 0x129   : > { %v572_v62 = vadd.f32 %v571_v61, %v1470_v43  ;;  %v643_v63 = vadd.f32 %v642_v59, %v612_v58 }
 0x12b   : > { %v573_v31 = vadd.f32 %v572_v62, %v1483_v54  ;;  %v644_v1 = vadd.f32 %v643_v63, %v613_v27 }
 0x12d   : > { %v645_v35 = vadd.f32 %v644_v1, %v614_v0  ;;  %v574_v2 = vadd.f32 %v573_v31, %v1497_v5 }
 0x12f   : > { %v646_v4 = vadd.f32 %v645_v35, %v615_v3  ;;  %v575_v39 = vadd.f32 %v574_v2, %v497_v21 }
 0x131   : > { %v576_v43 = vadd.f32 %v575_v39, %v1425_v30  ;;  %v647_v8 = vadd.f32 %v646_v4, %v616_v6  ;;  %v621_v30 = vmul.f32 %v1477_v46, %v1477_v46 }
 0x133   : > { %v577_v54 = vadd.f32 %v576_v43, %v1438_v34  ;;  %v648_v10 = vadd.f32 %v647_v8, %v617_v7 }
 0x135   : > { %v578_v5 = vadd.f32 %v577_v54, %v1451_v38  ;;  %v649_v13 = vadd.f32 %v648_v10, %v618_v9 }
 0x137   : > { %v650_v15 = vadd.f32 %v649_v13, %v619_v12  ;;  %v579_v16 = vadd.f32 %v578_v5, %v1464_v42 }
 0x139   : > { %v580_v17 = vadd.f32 %v579_v16, %v1477_v46  ;;  %v651_v18 = vadd.f32 %v650_v15, %v620_v14 }
 0x13b   : > { %v581_v34 = vadd.f32 %v580_v17, %v1490_v60  ;;  %v652_v20 = vadd.f32 %v651_v18, %v621_v30 }
 0x13d   : > { %v653_v38 = vadd.f32 %v652_v20, %v622_v19  ;;  %v582_v21 = vadd.f32 %v581_v34, %v1502_v11 }
 0x13f   : > { %v654_v23 = vadd.f32 %v653_v38, %v623_v22  ;;  %v583_v42 = vadd.f32 %v582_v21, %v1528_v25 }
 0x141   : > { %v584_v46 = vrot.slane %v583_v42, 4  ;;  %v655_v26 = vadd.f32 %v654_v23, %v624_v24 }
 0x143   : > { %v585_v28 = vadd.f32 %v584_v46, %v583_v42  ;;  %v656_v29 = vrot.slane %v655_v26, 4 }
 0x145   : > { %v586_v32 = vrot.slane %v585_v28, 2  ;;  %v657_v33 = vadd.f32 %v656_v29, %v655_v26 }
 0x147   : > { %v587_v60 = vadd.f32 %v586_v32, %v585_v28  ;;  %v658_v36 = vrot.slane %v657_v33, 2 }
 0x149   : > { %v659_v37 = vadd.f32 %v658_v36, %v657_v33  ;;  %v588_v40 = vrot.slane %v587_v60, 1 }
 0x14b   : > { %v589_v11 = vadd.f32 %v588_v40, %v587_v60  ;;  %v660_v25 = vrot.slane %v659_v37, 1 }
 0x14d   : > { %v590_v47 = vadd.f32 %v589_v11, %v552_v41  ;;  %v661_v48 = vadd.f32 %v660_v25, %v659_v37 }
 0x14f   : > { %591 = vst [vmem:[#allocation8] sm:$0x1] %v590_v47  ;;  %v662_v49 = vadd.f32 %v661_v48, %v592_v44 }
 0x150   : > { %985 = dma.vmem_to_hbm [thread:$0]  (%p1644_p5), %s693_s30, 16, %s695_s23, [#allocation9]  }
 0x151   : > { %663 = vst [vmem:[#allocation10] sm:$0x1] %v662_v49 }
 0x152   : > { %987 = dma.vmem_to_hbm [thread:$0]  (%p1645_p0), %s705_s27, 16, %s707_s13, [#allocation9]  }
 0x153   : > { %1222 = dma.done.wait (%p1646_p3), [#allocation9], 32   ;;  %p1647_p7 = pmov %p1645_p0 }
 0x155   : > { %1224 = vsyncadd (%p1647_p7), [#allocation9], 4294967264 }
 0x156 PF: > { %s728_s12 = sand.u32 1, %s1231_s15   ;;  %p1648_p10 = scmp.ge.s32.totalorder %s1243_s18, 2 }
 0x157   : > { %s729_s14 = scalar_lea.sflag [#allocation4], %s728_s12 }
 0x158   : > { %p1002_p2 = pnand %p1648_p10, %p1313_p6 }
 0x15a   : > { %p1003_p1 = pneg %p1002_p2 }
 0x15c   : > { %1226 = dma.done.wait (%p1003_p1), %s729_s14, 4096  }
 0x15d   : > { %1228 = vsyncadd (%p1003_p1), %s729_s14, 4294963200  ;;  %p20_p4 = scmp.ge.s32.totalorder %s1332_s29, 4   ;;  %s1649_s15 = smov %s1235_s16 }
 0x15e   : > { %s1650_s16 = smov %s1239_s17  ;;  %s1651_s17 = smov %s1344_s8 }
 0x15f   : > { %s1652_s18 = smov %s1332_s29  ;;  %22 = sbr.rel (!%p20_p4) target bundleno = 7 (0x7), region = 97 }
 0x164   :  { %735 = vsyncpa [#allocation3], 1 }
 0x165   :  { %737 = vsyncpa [#allocation3 + $0x1], 1 }
 0x166   :  { %738 = vsyncpa [#allocation6], 1 }
 0x167   :  { %739 = vsyncpa [#allocation4], 1 }
 0x168   :  { %741 = vsyncpa [#allocation4 + $0x1], 1 }
 0x169   :  { %742 = vsyncpa [#allocation9], 1 }

</bundles_post_ra>
